<compile_context>
chip_gen: v6e
topology: v6e:2x2x1
jax: 0.10.0
libtpu: 0.0.40
codegen_flags: <defaults>
</compile_context>

<pallas_src>
import jax
import jax.numpy as jnp
from jax.experimental import pallas as pl
from jax.experimental.pallas import tpu as pltpu


# ----------------------------- configuration --------------------------------
B = 2          # batch
S = 8          # sequence length
D = 32         # embed_dim (d_model)
H = 4          # encoder_attention_heads
HD = D // H    # head_dim
F = 64         # encoder_ffn_dim
BS = B * S
LN_EPS = 1e-5
SCALING = HD ** -0.5
NEG = -1e9     # additive mask value for cross-batch (block-diagonal) entries

# ----------------- packed weight-slab row layout (width 128) ----------------
R_WQKV = 0                 # rows [0, 32)   cols [0, 96)  : [wq*scale | wk | wv]
R_WO = D                   # rows [32, 64)  cols [0, 32)  : out-proj weight
R_W1 = 2 * D               # rows [64, 96)  cols [0, 64)  : fc1 weight
R_W2 = 3 * D               # rows [96, 160) cols [0, 32)  : fc2 weight
R_BQKV = 3 * D + F         # row  160       cols [0, 96)  : [bq*scale | 0 | bv]
R_B1 = R_BQKV + 1          # row  161       cols [0, 64)  : fc1 bias
R_VEC = R_B1 + 1           # rows [162,168) cols [0, 32)  : ln1g,ln1b,ln2g,ln2b,bo,b2
R_TOTAL = R_VEC + 6        # 168 rows (multiple of 8)
SLAB_W = 128


def _layer_norm(x, g, b):
    # x: (BS, D); g, b: (1, D)
    mu = jnp.mean(x, axis=-1, keepdims=True)
    xc = x - mu
    var = jnp.mean(xc * xc, axis=-1, keepdims=True)
    inv = jax.lax.rsqrt(var + LN_EPS)
    return xc * inv * g + b


def _gelu_exact(x):
    # ACT2FN['gelu'] == erf-exact GELU
    return 0.5 * x * (1.0 + jax.lax.erf(x * 0.7071067811865476))


def encoder_layer_kernel(x_ref, mask_ref, hm_ref, w_ref, o_ref, attn_scr):
    x = x_ref[...]                                   # (BS, D)
    residual = x

    # ---- static views into the packed weight slab (free) ----
    ln1g = w_ref[R_VEC + 0:R_VEC + 1, 0:D]
    ln1b = w_ref[R_VEC + 1:R_VEC + 2, 0:D]
    ln2g = w_ref[R_VEC + 2:R_VEC + 3, 0:D]
    ln2b = w_ref[R_VEC + 3:R_VEC + 4, 0:D]
    bo = w_ref[R_VEC + 4:R_VEC + 5, 0:D]
    b2 = w_ref[R_VEC + 5:R_VEC + 6, 0:D]

    # ---- self_attn_layer_norm ----
    h = _layer_norm(x, ln1g, ln1b)

    # ---- fused QKV projection (scaling + zero k-bias folded at pack time) ----
    wqkv = w_ref[R_WQKV:R_WQKV + D, 0:3 * D]          # (D, 3D)
    bqkv = w_ref[R_BQKV:R_BQKV + 1, 0:3 * D]          # (1, 3D)
    qkv = jnp.dot(h, wqkv, preferred_element_type=jnp.float32) + bqkv
    q = qkv[:, 0:D]
    k = qkv[:, D:2 * D]
    # fold the per-head mask into V:  (c*P) @ V == P @ (c*V)
    v = qkv[:, 2 * D:3 * D] * hm_ref[...]             # (BS, D)

    # single transpose of the whole K slab; per-head slices are 8-row
    # (vreg-aligned) sublane slices -> no per-iteration relayouts.
    kT = k.T                                          # (D, BS)
    mask = mask_ref[...]                              # (BS, BS) block-diag + attn mask

    # ---- eager MHA: batch collapsed via block-diagonal masking ----
    for hh in range(H):
        c0 = hh * HD
        s = jnp.dot(q[:, c0:c0 + HD], kT[c0:c0 + HD, :],
                    preferred_element_type=jnp.float32)        # (BS, BS)
        s = s + mask
        m = jnp.max(s, axis=-1, keepdims=True)
        e = jnp.exp(s - m)
        p = e * pl.reciprocal(jnp.sum(e, axis=-1, keepdims=True), approx=True)
        # write each head's result at a static lane offset (no concatenates)
        attn_scr[:, c0:c0 + HD] = jnp.dot(p, v[:, c0:c0 + HD],
                                          preferred_element_type=jnp.float32)

    attn = attn_scr[...]                              # (BS, D)
    wo = w_ref[R_WO:R_WO + D, 0:D]
    attn = jnp.dot(attn, wo, preferred_element_type=jnp.float32) + bo
    h1 = residual + attn                              # dropout is identity (eval)

    # ---- feed-forward block ----
    h2 = _layer_norm(h1, ln2g, ln2b)
    w1 = w_ref[R_W1:R_W1 + D, 0:F]
    b1 = w_ref[R_B1:R_B1 + 1, 0:F]
    w2 = w_ref[R_W2:R_W2 + F, 0:D]
    f = jnp.dot(h2, w1, preferred_element_type=jnp.float32) + b1
    f = _gelu_exact(f)
    f = jnp.dot(f, w2, preferred_element_type=jnp.float32) + b2

    # TODO(synk): float16 clamp branch omitted (layer runs in float32).
    o_ref[...] = h1 + f                               # single whole-tile store


# -------------------------- host-side param packing --------------------------
def pack_params(params):
    """One-time packing of ALL parameters into a single lane-dense slab."""
    (ln1g, ln1b, wq, bq, wk, wv, bv, wo, bo, ln2g, ln2b, w1, b1, w2, b2) = params
    slab = jnp.zeros((R_TOTAL, SLAB_W), jnp.float32)
    slab = slab.at[R_WQKV:R_WQKV + D, 0:D].set(wq * SCALING)
    slab = slab.at[R_WQKV:R_WQKV + D, D:2 * D].set(wk)
    slab = slab.at[R_WQKV:R_WQKV + D, 2 * D:3 * D].set(wv)
    slab = slab.at[R_WO:R_WO + D, 0:D].set(wo)
    slab = slab.at[R_W1:R_W1 + D, 0:F].set(w1)
    slab = slab.at[R_W2:R_W2 + F, 0:D].set(w2)
    slab = slab.at[R_BQKV, 0:D].set(bq[0] * SCALING)      # k-proj has no bias
    slab = slab.at[R_BQKV, 2 * D:3 * D].set(bv[0])
    slab = slab.at[R_B1, 0:F].set(b1[0])
    slab = slab.at[R_VEC + 0, 0:D].set(ln1g[0])
    slab = slab.at[R_VEC + 1, 0:D].set(ln1b[0])
    slab = slab.at[R_VEC + 2, 0:D].set(ln2g[0])
    slab = slab.at[R_VEC + 3, 0:D].set(ln2b[0])
    slab = slab.at[R_VEC + 4, 0:D].set(bo[0])
    slab = slab.at[R_VEC + 5, 0:D].set(b2[0])
    return slab


def qwen2audio_encoder_layer(x, attention_mask, layer_head_mask, weight_slab):
    """x: (B,S,D) f32, attention_mask: (B,1,S,S) f32, layer_head_mask: (H,) f32."""
    x_flat = x.reshape(BS, D)                      # free (contiguous) reshape

    # block-diagonal additive mask: cross-batch blocks get NEG so one stacked
    # (BS, BS) softmax equals the per-batch softmax exactly (exp(NEG) == 0).
    m = attention_mask.reshape(B, S, S)
    mask_bd = jnp.full((BS, BS), NEG, jnp.float32)
    for b in range(B):
        mask_bd = mask_bd.at[b * S:(b + 1) * S, b * S:(b + 1) * S].set(m[b])

    # per-head mask expanded to the embedding dim (folded into V in-kernel)
    hm = jnp.repeat(layer_head_mask, HD).reshape(1, D)

    vmem = pl.BlockSpec(memory_space=pltpu.MemorySpace.VMEM)
    out_flat = pl.pallas_call(
        encoder_layer_kernel,
        out_shape=jax.ShapeDtypeStruct((BS, D), jnp.float32),
        in_specs=[vmem, vmem, vmem, vmem],
        out_specs=vmem,
        scratch_shapes=[pltpu.VMEM((BS, D), jnp.float32)],
    )(x_flat, mask_bd, hm, weight_slab)
    return out_flat.reshape(B, S, D)


# -------------------------- pure-JAX reference -------------------------------
def reference_layer(x, mask, head_mask, params):
    (ln1g, ln1b, wq, bq, wk, wv, bv, wo, bo, ln2g, ln2b, w1, b1, w2, b2) = params

    def ln(t, g, b):
        mu = jnp.mean(t, -1, keepdims=True)
        var = jnp.mean((t - mu) ** 2, -1, keepdims=True)
        return (t - mu) / jnp.sqrt(var + LN_EPS) * g + b

    res = x
    h = ln(x, ln1g, ln1b)
    q = (h @ wq + bq) * SCALING
    k = h @ wk
    v = h @ wv + bv
    qh = q.reshape(B, S, H, HD).transpose(0, 2, 1, 3)
    kh = k.reshape(B, S, H, HD).transpose(0, 2, 1, 3)
    vh = v.reshape(B, S, H, HD).transpose(0, 2, 1, 3)
    scores = jnp.einsum('bhqd,bhkd->bhqk', qh, kh) + mask
    w = jax.nn.softmax(scores, axis=-1)
    w = head_mask.reshape(1, H, 1, 1) * w
    attn = jnp.einsum('bhqk,bhkd->bhqd', w, vh)
    attn = attn.transpose(0, 2, 1, 3).reshape(B, S, D)
    attn = attn @ wo + bo
    h = res + attn
    res = h
    h2 = ln(h, ln2g, ln2b)
    pre = h2 @ w1 + b1
    h2 = 0.5 * pre * (1.0 + jax.lax.erf(pre / jnp.sqrt(2.0)))
    h2 = h2 @ w2 + b2
    return res + h2


# ------------------------------- main ----------------------------------------
if __name__ == "__main__":
    key = jax.random.PRNGKey(0)
    ks = jax.random.split(key, 20)

    x = jax.random.normal(ks[0], (B, S, D), jnp.float32)

    # additive attention mask: mask out the last 2 source positions of batch 1
    mask = jnp.zeros((B, 1, S, S), jnp.float32)
    mask = mask.at[1, 0, :, S - 2:].set(NEG)

    layer_head_mask = jnp.array([1.0, 0.5, 1.0, 0.0], jnp.float32)  # (H,)

    sc = 0.08
    ln1g = jnp.ones((1, D), jnp.float32)
    ln1b = jnp.zeros((1, D), jnp.float32)
    wq = sc * jax.random.normal(ks[1], (D, D), jnp.float32)
    bq = sc * jax.random.normal(ks[2], (1, D), jnp.float32)
    wk = sc * jax.random.normal(ks[3], (D, D), jnp.float32)
    wv = sc * jax.random.normal(ks[4], (D, D), jnp.float32)
    bv = sc * jax.random.normal(ks[5], (1, D), jnp.float32)
    wo = sc * jax.random.normal(ks[6], (D, D), jnp.float32)
    bo = sc * jax.random.normal(ks[7], (1, D), jnp.float32)
    ln2g = jnp.ones((1, D), jnp.float32)
    ln2b = jnp.zeros((1, D), jnp.float32)
    w1 = sc * jax.random.normal(ks[8], (D, F), jnp.float32)
    b1 = sc * jax.random.normal(ks[9], (1, F), jnp.float32)
    w2 = sc * jax.random.normal(ks[10], (F, D), jnp.float32)
    b2 = sc * jax.random.normal(ks[11], (1, D), jnp.float32)

    params = (ln1g, ln1b, wq, bq, wk, wv, bv, wo, bo, ln2g, ln2b, w1, b1, w2, b2)
    weight_slab = pack_params(params)

    out = qwen2audio_encoder_layer(x, mask, layer_head_mask, weight_slab)
    out = jax.block_until_ready(out)

    ref = reference_layer(x, mask, layer_head_mask, params)
    assert out.shape == (B, S, D)
    # tolerance allows for the approximate EUP reciprocal in the softmax
    assert jnp.allclose(out, ref, rtol=2e-3, atol=2e-3), (
        f"max abs err = {jnp.max(jnp.abs(out - ref))}")

    print("KERNEL_OK")
</pallas_src>

<mosaic_0001>
module attributes {stable_mosaic.version = 11 : i64} {
  func.func @encoder_layer_kernel(%arg0: memref<16x32xf32, #tpu.memory_space<vmem>>, %arg1: memref<16x16xf32, #tpu.memory_space<vmem>>, %arg2: memref<1x32xf32, #tpu.memory_space<vmem>>, %arg3: memref<168x128xf32, #tpu.memory_space<vmem>>, %arg4: memref<16x32xf32, #tpu.memory_space<vmem>>, %arg5: memref<16x32xf32, #tpu.memory_space<vmem>>) attributes {dimension_semantics = [], scalar_prefetch = 0 : i64, scratch_operands = 1 : i64, tpu.core_type = #tpu.core_type<tc>} {
    %c0 = arith.constant 0 : index
    %c0_0 = arith.constant 0 : index
    %0 = vector.load %arg0[%c0, %c0_0] : memref<16x32xf32, #tpu.memory_space<vmem>>, vector<16x32xf32>
    %c162 = arith.constant 162 : index
    %c0_1 = arith.constant 0 : index
    %1 = vector.load %arg3[%c162, %c0_1] : memref<168x128xf32, #tpu.memory_space<vmem>>, vector<1x32xf32>
    %c163 = arith.constant 163 : index
    %c0_2 = arith.constant 0 : index
    %2 = vector.load %arg3[%c163, %c0_2] : memref<168x128xf32, #tpu.memory_space<vmem>>, vector<1x32xf32>
    %c164 = arith.constant 164 : index
    %c0_3 = arith.constant 0 : index
    %3 = vector.load %arg3[%c164, %c0_3] : memref<168x128xf32, #tpu.memory_space<vmem>>, vector<1x32xf32>
    %c165 = arith.constant 165 : index
    %c0_4 = arith.constant 0 : index
    %4 = vector.load %arg3[%c165, %c0_4] : memref<168x128xf32, #tpu.memory_space<vmem>>, vector<1x32xf32>
    %c166 = arith.constant 166 : index
    %c0_5 = arith.constant 0 : index
    %5 = vector.load %arg3[%c166, %c0_5] : memref<168x128xf32, #tpu.memory_space<vmem>>, vector<1x32xf32>
    %c167 = arith.constant 167 : index
    %c0_6 = arith.constant 0 : index
    %6 = vector.load %arg3[%c167, %c0_6] : memref<168x128xf32, #tpu.memory_space<vmem>>, vector<1x32xf32>
    %cst = arith.constant dense<0.000000e+00> : vector<16xf32>
    %7 = vector.multi_reduction <add>, %0, %cst [1] : vector<16x32xf32> to vector<16xf32>
    %8 = vector.shape_cast %7 : vector<16xf32> to vector<16x1xf32>
    %cst_7 = arith.constant 3.200000e+01 : f32
    %9 = vector.broadcast %cst_7 : f32 to vector<16x1xf32>
    %10 = arith.divf %8, %9 : vector<16x1xf32>
    %11 = vector.broadcast %10 : vector<16x1xf32> to vector<16x32xf32>
    %12 = arith.subf %0, %11 : vector<16x32xf32>
    %13 = arith.mulf %12, %12 : vector<16x32xf32>
    %cst_8 = arith.constant dense<0.000000e+00> : vector<16xf32>
    %14 = vector.multi_reduction <add>, %13, %cst_8 [1] : vector<16x32xf32> to vector<16xf32>
    %15 = vector.shape_cast %14 : vector<16xf32> to vector<16x1xf32>
    %cst_9 = arith.constant 3.200000e+01 : f32
    %16 = vector.broadcast %cst_9 : f32 to vector<16x1xf32>
    %17 = arith.divf %15, %16 : vector<16x1xf32>
    %cst_10 = arith.constant 9.99999974E-6 : f32
    %18 = vector.broadcast %cst_10 : f32 to vector<16x1xf32>
    %19 = arith.addf %17, %18 : vector<16x1xf32>
    %20 = math.rsqrt %19 : vector<16x1xf32>
    %21 = vector.broadcast %20 : vector<16x1xf32> to vector<16x32xf32>
    %22 = arith.mulf %12, %21 : vector<16x32xf32>
    %23 = vector.broadcast %1 : vector<1x32xf32> to vector<16x32xf32>
    %24 = arith.mulf %22, %23 : vector<16x32xf32>
    %25 = vector.broadcast %2 : vector<1x32xf32> to vector<16x32xf32>
    %26 = arith.addf %24, %25 : vector<16x32xf32>
    %c0_11 = arith.constant 0 : index
    %c0_12 = arith.constant 0 : index
    %27 = vector.load %arg3[%c0_11, %c0_12] : memref<168x128xf32, #tpu.memory_space<vmem>>, vector<32x96xf32>
    %c160 = arith.constant 160 : index
    %c0_13 = arith.constant 0 : index
    %28 = vector.load %arg3[%c160, %c0_13] : memref<168x128xf32, #tpu.memory_space<vmem>>, vector<1x96xf32>
    %cst_14 = arith.constant dense<0.000000e+00> : vector<16x96xf32>
    %29 = tpu.matmul %26, %27, %cst_14 {dimension_numbers = #tpu.dot_dimension_numbers<[1], [0], [0], [1], [0, 0, 1, 1], [], []>} : vector<16x32xf32>, vector<32x96xf32>, vector<16x96xf32> -> vector<16x96xf32>
    %30 = vector.broadcast %28 : vector<1x96xf32> to vector<16x96xf32>
    %31 = arith.addf %29, %30 : vector<16x96xf32>
    %32 = vector.extract_strided_slice %31 {offsets = [0, 0], sizes = [16, 32], strides = [1, 1]} : vector<16x96xf32> to vector<16x32xf32>
    %33 = vector.extract_strided_slice %31 {offsets = [0, 32], sizes = [16, 32], strides = [1, 1]} : vector<16x96xf32> to vector<16x32xf32>
    %34 = vector.extract_strided_slice %31 {offsets = [0, 64], sizes = [16, 32], strides = [1, 1]} : vector<16x96xf32> to vector<16x32xf32>
    %c0_15 = arith.constant 0 : index
    %c0_16 = arith.constant 0 : index
    %35 = vector.load %arg2[%c0_15, %c0_16] : memref<1x32xf32, #tpu.memory_space<vmem>>, vector<1x32xf32>
    %36 = vector.broadcast %35 : vector<1x32xf32> to vector<16x32xf32>
    %37 = arith.mulf %34, %36 : vector<16x32xf32>
    %38 = tpu.transpose %33, [1, 0] : vector<16x32xf32> -> vector<32x16xf32>
    %c0_17 = arith.constant 0 : index
    %c0_18 = arith.constant 0 : index
    %39 = vector.load %arg1[%c0_17, %c0_18] : memref<16x16xf32, #tpu.memory_space<vmem>>, vector<16x16xf32>
    %40 = vector.extract_strided_slice %32 {offsets = [0, 0], sizes = [16, 8], strides = [1, 1]} : vector<16x32xf32> to vector<16x8xf32>
    %41 = vector.extract_strided_slice %38 {offsets = [0, 0], sizes = [8, 16], strides = [1, 1]} : vector<32x16xf32> to vector<8x16xf32>
    %cst_19 = arith.constant dense<0.000000e+00> : vector<16x16xf32>
    %42 = tpu.matmul %40, %41, %cst_19 {dimension_numbers = #tpu.dot_dimension_numbers<[1], [0], [0], [1], [0, 0, 1, 1], [], []>} : vector<16x8xf32>, vector<8x16xf32>, vector<16x16xf32> -> vector<16x16xf32>
    %43 = arith.addf %42, %39 : vector<16x16xf32>
    %cst_20 = arith.constant dense<0xFF800000> : vector<16xf32>
    %44 = vector.multi_reduction <maximumf>, %43, %cst_20 [1] : vector<16x16xf32> to vector<16xf32>
    %45 = vector.shape_cast %44 : vector<16xf32> to vector<16x1xf32>
    %46 = vector.broadcast %45 : vector<16x1xf32> to vector<16x16xf32>
    %47 = arith.subf %43, %46 : vector<16x16xf32>
    %48 = math.exp %47 : vector<16x16xf32>
    %cst_21 = arith.constant dense<0.000000e+00> : vector<16xf32>
    %49 = vector.multi_reduction <add>, %48, %cst_21 [1] : vector<16x16xf32> to vector<16xf32>
    %50 = vector.shape_cast %49 : vector<16xf32> to vector<16x1xf32>
    %51 = tpu.reciprocal %50 {approx = true} : vector<16x1xf32> -> vector<16x1xf32>
    %52 = vector.broadcast %51 : vector<16x1xf32> to vector<16x16xf32>
    %53 = arith.mulf %48, %52 : vector<16x16xf32>
    %54 = vector.extract_strided_slice %37 {offsets = [0, 0], sizes = [16, 8], strides = [1, 1]} : vector<16x32xf32> to vector<16x8xf32>
    %cst_22 = arith.constant dense<0.000000e+00> : vector<16x8xf32>
    %55 = tpu.matmul %53, %54, %cst_22 {dimension_numbers = #tpu.dot_dimension_numbers<[1], [0], [0], [1], [0, 0, 1, 1], [], []>} : vector<16x16xf32>, vector<16x8xf32>, vector<16x8xf32> -> vector<16x8xf32>
    %c0_23 = arith.constant 0 : index
    %c0_24 = arith.constant 0 : index
    %56 = vector.load %arg5[%c0_23, %c0_24] : memref<16x32xf32, #tpu.memory_space<vmem>>, vector<16x8xf32>
    tpu.vector_store %arg5[%c0_23, %c0_24], %55 {strides = array<i32>} : memref<16x32xf32, #tpu.memory_space<vmem>>, vector<16x8xf32>,
    %57 = vector.extract_strided_slice %32 {offsets = [0, 8], sizes = [16, 8], strides = [1, 1]} : vector<16x32xf32> to vector<16x8xf32>
    %58 = vector.extract_strided_slice %38 {offsets = [8, 0], sizes = [8, 16], strides = [1, 1]} : vector<32x16xf32> to vector<8x16xf32>
    %cst_25 = arith.constant dense<0.000000e+00> : vector<16x16xf32>
    %59 = tpu.matmul %57, %58, %cst_25 {dimension_numbers = #tpu.dot_dimension_numbers<[1], [0], [0], [1], [0, 0, 1, 1], [], []>} : vector<16x8xf32>, vector<8x16xf32>, vector<16x16xf32> -> vector<16x16xf32>
    %60 = arith.addf %59, %39 : vector<16x16xf32>
    %cst_26 = arith.constant dense<0xFF800000> : vector<16xf32>
    %61 = vector.multi_reduction <maximumf>, %60, %cst_26 [1] : vector<16x16xf32> to vector<16xf32>
    %62 = vector.shape_cast %61 : vector<16xf32> to vector<16x1xf32>
    %63 = vector.broadcast %62 : vector<16x1xf32> to vector<16x16xf32>
    %64 = arith.subf %60, %63 : vector<16x16xf32>
    %65 = math.exp %64 : vector<16x16xf32>
    %cst_27 = arith.constant dense<0.000000e+00> : vector<16xf32>
    %66 = vector.multi_reduction <add>, %65, %cst_27 [1] : vector<16x16xf32> to vector<16xf32>
    %67 = vector.shape_cast %66 : vector<16xf32> to vector<16x1xf32>
    %68 = tpu.reciprocal %67 {approx = true} : vector<16x1xf32> -> vector<16x1xf32>
    %69 = vector.broadcast %68 : vector<16x1xf32> to vector<16x16xf32>
    %70 = arith.mulf %65, %69 : vector<16x16xf32>
    %71 = vector.extract_strided_slice %37 {offsets = [0, 8], sizes = [16, 8], strides = [1, 1]} : vector<16x32xf32> to vector<16x8xf32>
    %cst_28 = arith.constant dense<0.000000e+00> : vector<16x8xf32>
    %72 = tpu.matmul %70, %71, %cst_28 {dimension_numbers = #tpu.dot_dimension_numbers<[1], [0], [0], [1], [0, 0, 1, 1], [], []>} : vector<16x16xf32>, vector<16x8xf32>, vector<16x8xf32> -> vector<16x8xf32>
    %c0_29 = arith.constant 0 : index
    %c8 = arith.constant 8 : index
    %73 = vector.load %arg5[%c0_29, %c8] : memref<16x32xf32, #tpu.memory_space<vmem>>, vector<16x8xf32>
    tpu.vector_store %arg5[%c0_29, %c8], %72 {strides = array<i32>} : memref<16x32xf32, #tpu.memory_space<vmem>>, vector<16x8xf32>,
    %74 = vector.extract_strided_slice %32 {offsets = [0, 16], sizes = [16, 8], strides = [1, 1]} : vector<16x32xf32> to vector<16x8xf32>
    %75 = vector.extract_strided_slice %38 {offsets = [16, 0], sizes = [8, 16], strides = [1, 1]} : vector<32x16xf32> to vector<8x16xf32>
    %cst_30 = arith.constant dense<0.000000e+00> : vector<16x16xf32>
    %76 = tpu.matmul %74, %75, %cst_30 {dimension_numbers = #tpu.dot_dimension_numbers<[1], [0], [0], [1], [0, 0, 1, 1], [], []>} : vector<16x8xf32>, vector<8x16xf32>, vector<16x16xf32> -> vector<16x16xf32>
    %77 = arith.addf %76, %39 : vector<16x16xf32>
    %cst_31 = arith.constant dense<0xFF800000> : vector<16xf32>
    %78 = vector.multi_reduction <maximumf>, %77, %cst_31 [1] : vector<16x16xf32> to vector<16xf32>
    %79 = vector.shape_cast %78 : vector<16xf32> to vector<16x1xf32>
    %80 = vector.broadcast %79 : vector<16x1xf32> to vector<16x16xf32>
    %81 = arith.subf %77, %80 : vector<16x16xf32>
    %82 = math.exp %81 : vector<16x16xf32>
    %cst_32 = arith.constant dense<0.000000e+00> : vector<16xf32>
    %83 = vector.multi_reduction <add>, %82, %cst_32 [1] : vector<16x16xf32> to vector<16xf32>
    %84 = vector.shape_cast %83 : vector<16xf32> to vector<16x1xf32>
    %85 = tpu.reciprocal %84 {approx = true} : vector<16x1xf32> -> vector<16x1xf32>
    %86 = vector.broadcast %85 : vector<16x1xf32> to vector<16x16xf32>
    %87 = arith.mulf %82, %86 : vector<16x16xf32>
    %88 = vector.extract_strided_slice %37 {offsets = [0, 16], sizes = [16, 8], strides = [1, 1]} : vector<16x32xf32> to vector<16x8xf32>
    %cst_33 = arith.constant dense<0.000000e+00> : vector<16x8xf32>
    %89 = tpu.matmul %87, %88, %cst_33 {dimension_numbers = #tpu.dot_dimension_numbers<[1], [0], [0], [1], [0, 0, 1, 1], [], []>} : vector<16x16xf32>, vector<16x8xf32>, vector<16x8xf32> -> vector<16x8xf32>
    %c0_34 = arith.constant 0 : index
    %c16 = arith.constant 16 : index
    %90 = vector.load %arg5[%c0_34, %c16] : memref<16x32xf32, #tpu.memory_space<vmem>>, vector<16x8xf32>
    tpu.vector_store %arg5[%c0_34, %c16], %89 {strides = array<i32>} : memref<16x32xf32, #tpu.memory_space<vmem>>, vector<16x8xf32>,
    %91 = vector.extract_strided_slice %32 {offsets = [0, 24], sizes = [16, 8], strides = [1, 1]} : vector<16x32xf32> to vector<16x8xf32>
    %92 = vector.extract_strided_slice %38 {offsets = [24, 0], sizes = [8, 16], strides = [1, 1]} : vector<32x16xf32> to vector<8x16xf32>
    %cst_35 = arith.constant dense<0.000000e+00> : vector<16x16xf32>
    %93 = tpu.matmul %91, %92, %cst_35 {dimension_numbers = #tpu.dot_dimension_numbers<[1], [0], [0], [1], [0, 0, 1, 1], [], []>} : vector<16x8xf32>, vector<8x16xf32>, vector<16x16xf32> -> vector<16x16xf32>
    %94 = arith.addf %93, %39 : vector<16x16xf32>
    %cst_36 = arith.constant dense<0xFF800000> : vector<16xf32>
    %95 = vector.multi_reduction <maximumf>, %94, %cst_36 [1] : vector<16x16xf32> to vector<16xf32>
    %96 = vector.shape_cast %95 : vector<16xf32> to vector<16x1xf32>
    %97 = vector.broadcast %96 : vector<16x1xf32> to vector<16x16xf32>
    %98 = arith.subf %94, %97 : vector<16x16xf32>
    %99 = math.exp %98 : vector<16x16xf32>
    %cst_37 = arith.constant dense<0.000000e+00> : vector<16xf32>
    %100 = vector.multi_reduction <add>, %99, %cst_37 [1] : vector<16x16xf32> to vector<16xf32>
    %101 = vector.shape_cast %100 : vector<16xf32> to vector<16x1xf32>
    %102 = tpu.reciprocal %101 {approx = true} : vector<16x1xf32> -> vector<16x1xf32>
    %103 = vector.broadcast %102 : vector<16x1xf32> to vector<16x16xf32>
    %104 = arith.mulf %99, %103 : vector<16x16xf32>
    %105 = vector.extract_strided_slice %37 {offsets = [0, 24], sizes = [16, 8], strides = [1, 1]} : vector<16x32xf32> to vector<16x8xf32>
    %cst_38 = arith.constant dense<0.000000e+00> : vector<16x8xf32>
    %106 = tpu.matmul %104, %105, %cst_38 {dimension_numbers = #tpu.dot_dimension_numbers<[1], [0], [0], [1], [0, 0, 1, 1], [], []>} : vector<16x16xf32>, vector<16x8xf32>, vector<16x8xf32> -> vector<16x8xf32>
    %c0_39 = arith.constant 0 : index
    %c24 = arith.constant 24 : index
    %107 = vector.load %arg5[%c0_39, %c24] : memref<16x32xf32, #tpu.memory_space<vmem>>, vector<16x8xf32>
    tpu.vector_store %arg5[%c0_39, %c24], %106 {strides = array<i32>} : memref<16x32xf32, #tpu.memory_space<vmem>>, vector<16x8xf32>,
    %c0_40 = arith.constant 0 : index
    %c0_41 = arith.constant 0 : index
    %108 = vector.load %arg5[%c0_40, %c0_41] : memref<16x32xf32, #tpu.memory_space<vmem>>, vector<16x32xf32>
    %c32 = arith.constant 32 : index
    %c0_42 = arith.constant 0 : index
    %109 = vector.load %arg3[%c32, %c0_42] : memref<168x128xf32, #tpu.memory_space<vmem>>, vector<32x32xf32>
    %cst_43 = arith.constant dense<0.000000e+00> : vector<16x32xf32>
    %110 = tpu.matmul %108, %109, %cst_43 {dimension_numbers = #tpu.dot_dimension_numbers<[1], [0], [0], [1], [0, 0, 1, 1], [], []>} : vector<16x32xf32>, vector<32x32xf32>, vector<16x32xf32> -> vector<16x32xf32>
    %111 = vector.broadcast %5 : vector<1x32xf32> to vector<16x32xf32>
    %112 = arith.addf %110, %111 : vector<16x32xf32>
    %113 = arith.addf %0, %112 : vector<16x32xf32>
    %cst_44 = arith.constant dense<0.000000e+00> : vector<16xf32>
    %114 = vector.multi_reduction <add>, %113, %cst_44 [1] : vector<16x32xf32> to vector<16xf32>
    %115 = vector.shape_cast %114 : vector<16xf32> to vector<16x1xf32>
    %cst_45 = arith.constant 3.200000e+01 : f32
    %116 = vector.broadcast %cst_45 : f32 to vector<16x1xf32>
    %117 = arith.divf %115, %116 : vector<16x1xf32>
    %118 = vector.broadcast %117 : vector<16x1xf32> to vector<16x32xf32>
    %119 = arith.subf %113, %118 : vector<16x32xf32>
    %120 = arith.mulf %119, %119 : vector<16x32xf32>
    %cst_46 = arith.constant dense<0.000000e+00> : vector<16xf32>
    %121 = vector.multi_reduction <add>, %120, %cst_46 [1] : vector<16x32xf32> to vector<16xf32>
    %122 = vector.shape_cast %121 : vector<16xf32> to vector<16x1xf32>
    %cst_47 = arith.constant 3.200000e+01 : f32
    %123 = vector.broadcast %cst_47 : f32 to vector<16x1xf32>
    %124 = arith.divf %122, %123 : vector<16x1xf32>
    %cst_48 = arith.constant 9.99999974E-6 : f32
    %125 = vector.broadcast %cst_48 : f32 to vector<16x1xf32>
    %126 = arith.addf %124, %125 : vector<16x1xf32>
    %127 = math.rsqrt %126 : vector<16x1xf32>
    %128 = vector.broadcast %127 : vector<16x1xf32> to vector<16x32xf32>
    %129 = arith.mulf %119, %128 : vector<16x32xf32>
    %130 = vector.broadcast %3 : vector<1x32xf32> to vector<16x32xf32>
    %131 = arith.mulf %129, %130 : vector<16x32xf32>
    %132 = vector.broadcast %4 : vector<1x32xf32> to vector<16x32xf32>
    %133 = arith.addf %131, %132 : vector<16x32xf32>
    %c64 = arith.constant 64 : index
    %c0_49 = arith.constant 0 : index
    %134 = vector.load %arg3[%c64, %c0_49] : memref<168x128xf32, #tpu.memory_space<vmem>>, vector<32x64xf32>
    %c161 = arith.constant 161 : index
    %c0_50 = arith.constant 0 : index
    %135 = vector.load %arg3[%c161, %c0_50] : memref<168x128xf32, #tpu.memory_space<vmem>>, vector<1x64xf32>
    %c96 = arith.constant 96 : index
    %c0_51 = arith.constant 0 : index
    %136 = vector.load %arg3[%c96, %c0_51] : memref<168x128xf32, #tpu.memory_space<vmem>>, vector<64x32xf32>
    %cst_52 = arith.constant dense<0.000000e+00> : vector<16x64xf32>
    %137 = tpu.matmul %133, %134, %cst_52 {dimension_numbers = #tpu.dot_dimension_numbers<[1], [0], [0], [1], [0, 0, 1, 1], [], []>} : vector<16x32xf32>, vector<32x64xf32>, vector<16x64xf32> -> vector<16x64xf32>
    %138 = vector.broadcast %135 : vector<1x64xf32> to vector<16x64xf32>
    %139 = arith.addf %137, %138 : vector<16x64xf32>
    %cst_53 = arith.constant 5.000000e-01 : f32
    %140 = vector.broadcast %cst_53 : f32 to vector<16x64xf32>
    %141 = arith.mulf %140, %139 : vector<16x64xf32>
    %cst_54 = arith.constant 0.707106769 : f32
    %142 = vector.broadcast %cst_54 : f32 to vector<16x64xf32>
    %143 = arith.mulf %139, %142 : vector<16x64xf32>
    %144 = math.erf %143 : vector<16x64xf32>
    %cst_55 = arith.constant 1.000000e+00 : f32
    %145 = vector.broadcast %cst_55 : f32 to vector<16x64xf32>
    %146 = arith.addf %145, %144 : vector<16x64xf32>
    %147 = arith.mulf %141, %146 : vector<16x64xf32>
    %cst_56 = arith.constant dense<0.000000e+00> : vector<16x32xf32>
    %148 = tpu.matmul %147, %136, %cst_56 {dimension_numbers = #tpu.dot_dimension_numbers<[1], [0], [0], [1], [0, 0, 1, 1], [], []>} : vector<16x64xf32>, vector<64x32xf32>, vector<16x32xf32> -> vector<16x32xf32>
    %149 = vector.broadcast %6 : vector<1x32xf32> to vector<16x32xf32>
    %150 = arith.addf %148, %149 : vector<16x32xf32>
    %151 = arith.addf %113, %150 : vector<16x32xf32>
    %c0_57 = arith.constant 0 : index
    %c0_58 = arith.constant 0 : index
    %152 = vector.load %arg4[%c0_57, %c0_58] : memref<16x32xf32, #tpu.memory_space<vmem>>, vector<16x32xf32>
    tpu.vector_store %arg4[%c0_57, %c0_58], %151 {strides = array<i32>} : memref<16x32xf32, #tpu.memory_space<vmem>>, vector<16x32xf32>,
    return
  }
}

</mosaic_0001>

<bundles_post_ra>
// kernel: tpu_custom_call.1
= control target key start
LH: loop header
LB: loop body
LE: loop exit
PB: predicated region body
PF: predicated region fallthrough
CT: control target
= control target key end

     0   :  { %9 = vsyncpa [#allocation4], 0  ;;  %s1967_s0 = inlined_call_operand.hbm [shape: f32[16,32], index: 0, kind: input, shape index: {}]   ;;  %s1968_s1 = inlined_call_operand.hbm [shape: f32[16,16], index: 1, kind: input, shape index: {}]   ;;  %s1969_s2 = inlined_call_operand.vmem [shape: f32[1,32], index: 2, kind: input, shape index: {}]   ;;  %s1970_s3 = inlined_call_operand.hbm [shape: f32[168,128], index: 3, kind: input, shape index: {}]   ;;  %s1971_s4 = inlined_call_operand.hbm [shape: f32[16,32], index: 4, kind: output, shape index: {}]  }
   0x1   :  { %10 = vsyncpa [#allocation7], 0 }
   0x2   :  { %11 = vsyncpa [#allocation5], 0  ;;  %s1752_s15 = smov [#allocation6]   ;;  %s1753_s17 = smov [#allocation3]  }
   0x3   :  { %s29_s16 = sshll.u32 %s1752_s15, 4  ;;  %s17_s18 = sshll.u32 %s1753_s17, 4  ;;  %s30_s16 = int_to_ptr.vmem [resolvable:$true] %s29_s16  ;;  %s18_s18 = int_to_ptr.vmem [resolvable:$true] %s17_s18 }
   0x4   :  { %s1674_s19 = scalar_lea.vmem %s30_s16, 256  ;;  %p1679_p1 = scmp.lt.s32.totalorder %s30_s16, %s30_s16 }
   0x5   :  { %p1675_p0 = scmp.ne.s32.totalorder %s30_s16, %s1674_s19  ;;  %p1680_p2 = scmp.lt.s32.totalorder %s1674_s19, %s1674_s19 }
   0x7   :  { %p1681_p3 = por %p1680_p2, %p1679_p1 }
   0x9   :  { %p1682_p4 = pnand %p1681_p3, %p1675_p0 }
   0xb   :  { %1685 = shalt.err (!%p1682_p4)
}
   0xc   :  { %s1754_s20 = smov 128   ;;  %s1755_s21 = smov 8  }
   0xd   :  { %35 = dma.hbm_to_vmem [thread:$0]  %s1968_s1, 256, %s30_s16, [#allocation7], %s1754_s20, %s1754_s20, %s1755_s21  }
   0xe   :  { %s1694_s24 = scalar_lea.vmem %s18_s18, 256  ;;  %p1699_p6 = scmp.lt.s32.totalorder %s18_s18, %s18_s18 }
   0xf   :  { %p1695_p5 = scmp.ne.s32.totalorder %s18_s18, %s1694_s24  ;;  %p1700_p7 = scmp.lt.s32.totalorder %s1694_s24, %s1694_s24 }
  0x11   :  { %p1701_p8 = por %p1700_p7, %p1699_p6 }
  0x13   :  { %p1702_p9 = pnand %p1701_p8, %p1695_p5 }
  0x15   :  { %1705 = shalt.err (!%p1702_p9)
}
  0x16   :  { %23 = dma.hbm_to_vmem [thread:$0]  %s1967_s0, 256, %s18_s18, [#allocation4], %s1754_s20, %s1754_s20, %s1755_s21  }
  0x17   :  { %s1756_s27 = smov [#allocation8]  }
  0x18   :  { %s43_s28 = sshll.u32 %s1756_s27, 4  ;;  %s44_s28 = int_to_ptr.vmem [resolvable:$true] %s43_s28 }
  0x19   :  { %s1714_s29 = scalar_lea.vmem %s44_s28, 2688  ;;  %p1719_p11 = scmp.lt.s32.totalorder %s44_s28, %s44_s28 }
  0x1a   :  { %p1715_p10 = scmp.ne.s32.totalorder %s44_s28, %s1714_s29  ;;  %p1720_p12 = scmp.lt.s32.totalorder %s1714_s29, %s1714_s29 }
  0x1c   :  { %p1721_p13 = por %p1720_p12, %p1719_p11 }
  0x1e   :  { %p1722_p0 = pnand %p1721_p13, %p1715_p10 }
  0x20   :  { %1725 = shalt.err (!%p1722_p0)
}
  0x21   :  { %49 = dma.hbm_to_vmem [thread:$0]  %s1970_s3, 2688, %s44_s28, [#allocation7], %s1754_s20, %s1754_s20, %s1755_s21  }
  0x22   :  { %1746 = dma.done.wait [#allocation4], 256  }
  0x23   :  { %1747 = vsyncadd [#allocation4], 4294967040 }
  0x24   :  { %1748 = dma.done.wait [#allocation7], 2944  }
  0x25   :  { %1749 = vsyncadd [#allocation7], 4294964352  ;;  %vm67_vm0 = vcmask 261120   ;;  %v1814_v0 = vld [vmem:[#allocation3] sm:$0xff]  ;;  %v1816_v1 = vld [vmem:[#allocation3 + $0x8] sm:$0xff]  ;;  %vm216_vm1 = vcmask 64512  }
  0x26   :  { %v68_v2 = vsel %vm67_vm0, %v1814_v0, 0.0  ;;  %v71_v3 = vsel %vm67_vm0, %v1816_v1, 0.0  ;;  %v110_v14 = vld [vmem:[#allocation8 + $0x18] sm:$0xff]  ;;  %v109_v15 = vld [vmem:[#allocation8 + $0x10] sm:$0xff]  ;;  %v108_v16 = vld [vmem:[#allocation8 + $0x8] sm:$0xff]  ;;  %s1757_s0 = smov 96  }
  0x27   :  { %69 = vadd.xlane.f32.xlu0 %v68_v2  ;;  %1495 = vmatprep.subr.mxu1 %v110_v14  ;;  %v107_v17 = vld [vmem:[#allocation8] sm:$0xff]  ;;  %s1758_s3 = smov 120   ;;  %s1759_s5 = smov 88   ;;  %v1852_v45 = vld [vmem:[#allocation6 + $0x8] sm:$0xff]  ;;  %v1854_v47 = vld [vmem:[#allocation6] sm:$0xff]  ;;  %vm300_vm2 = vcmask 130048  }
  0x28   :  { %1496 = vmatpush3.msra.mxu1 %v110_v14  ;;  %v1394_v25 = vld [vmem:[#allocation8 + $0xa2] ss:$0 sm:$0xff]  ;;  %v1395_v27 = vld [vmem:[#allocation8 + $0xa3] ss:$0 sm:$0xff]  ;;  %v1396_v34 = vld [vmem:[#allocation8 + $0xa0] ss:$0 sm:$0xff] }
  0x29   :  { %1497 = vmatprep.subr.mxu1 %v109_v15  ;;  %v1399_v59 = vld [vmem:[%s1969_s2] ss:$0 sm:$0xff]  ;;  %s1760_s8 = smov 64   ;;  %s1761_s9 = smov 80   ;;  %vm622_vm3 = vcmask 130112   ;;  %vm833_vm4 = vcmask 195712  }
  0x2a   :  { %1498 = vmatpush3.msra.mxu1 %v109_v15  ;;  %s1762_s2 = smov 56   ;;  %s1763_s10 = smov 112   ;;  %vm1044_vm5 = vcmask 261312   ;;  %vm1290_vm6 = vcmask 523264  }
  0x2b   :  { %72 = vadd.xlane.f32.xlu0 %v71_v3  ;;  %1499 = vmatprep.subr.mxu1 %v108_v16  ;;  %s1764_s11 = smov 48   ;;  %s1765_s12 = smov 72  }
  0x2c   :  { %1500 = vmatpush3.msra.mxu1 %v108_v16  ;;  %s1766_s13 = smov 104   ;;  %s1767_s14 = smov 40  }
  0x2d   :  { %1501 = vmatprep.subr.mxu1 %v107_v17  ;;  %s1768_s15 = smov 16   ;;  %s1769_s16 = smov 24  }
  0x2e   :  { %1502 = vmatpush3.msra.mxu1 %v107_v17  ;;  %s1770_s17 = smov [#allocation9]  }
  0x2f   :  { %s1381_s18 = sshll.u32 %s1770_s17, 4  ;;  %s1382_s18 = int_to_ptr.vmem [resolvable:$true] %s1381_s18 }
  0x30   :  { %s1726_s19 = scalar_lea.vmem %s1382_s18, 256  ;;  %p1731_p2 = scmp.lt.s32.totalorder %s1382_s18, %s1382_s18 }
  0x31   :  { %p1727_p1 = scmp.ne.s32.totalorder %s1382_s18, %s1726_s19  ;;  %p1732_p3 = scmp.lt.s32.totalorder %s1726_s19, %s1726_s19 }
  0x33   :  { %p1733_p4 = por %p1732_p3, %p1731_p2 }
  0x35   :  { %p1734_p5 = pnand %p1733_p4, %p1727_p1 }
  0xb0   :  { %v70_v4 = vpop.xlane.xlu0 %69 }
  0xb1   :  { %v75_v5 = vmul.f32 0.03125, %v70_v4 }
  0xb3   :  { %v77_v6 = vsub.f32 %v1814_v0, %v75_v5 }
  0xb4   :  { %v73_v7 = vpop.xlane.xlu0 %72 }
  0xb5   :  { %v76_v8 = vmul.f32 0.03125, %v73_v7  ;;  %v79_v9 = vmul.f32 %v77_v6, %v77_v6 }
  0xb7   :  { %v78_v10 = vsub.f32 %v1816_v1, %v76_v8  ;;  %v81_v11 = vsel %vm67_vm0, %v79_v9, 0.0 }
  0xb8   :  { %82 = vadd.xlane.f32.xlu1 %v81_v11 }
  0xb9   :  { %v80_v12 = vmul.f32 %v78_v10, %v78_v10 }
  0xbb   :  { %v84_v13 = vsel %vm67_vm0, %v80_v12, 0.0 }
  0xbc   :  { %85 = vadd.xlane.f32.xlu1 %v84_v13 }
 0x141   :  { %v83_v18 = vpop.xlane.xlu1 %82 }
 0x142   :  { %v87_v19 = vmul.f32 0.03125, %v83_v18 }
 0x144   :  { %v89_v20 = vadd.f32 1e-05, %v87_v19 }
 0x145   :  { %v86_v21 = vpop.xlane.xlu1 %85 }
 0x146   :  { %1622 = vrsqrt.f32 %v89_v20  ;;  %v88_v22 = vmul.f32 0.03125, %v86_v21 }
 0x148   :  { %v90_v23 = vadd.f32 1e-05, %v88_v22 }
 0x14a   :  { %1624 = vrsqrt.f32 %v90_v23 }
 0x153   :  { %v1623_v24 = vpop.eup %1622 }
 0x154   :  { %v93_v26 = vmul.f32 %v1623_v24, %v77_v6 }
 0x156   :  { %v99_v28 = vmul.f32 %v1394_v25, %v93_v26 }
 0x157   :  { %v1625_v29 = vpop.eup %1624 }
 0x158   :  { %v94_v30 = vmul.f32 %v1625_v29, %v78_v10  ;;  %v105_v31 = vadd.f32 %v1395_v27, %v99_v28 }
 0x15a   :  { %v100_v32 = vmul.f32 %v1394_v25, %v94_v30  ;;  %1503 = vmatprep.mubr.msk.f32.mxu1 %vm67_vm0, %v105_v31 }
 0x15c   :  { %v106_v33 = vadd.f32 %v1395_v27, %v100_v32 }
 0x15e   :  { %1504 = vmatmul.mubr.msk.f32.vlgmr.msra.gmra.mxu1 %vm67_vm0, %v106_v33 }
 0x21e   :  { %v1505_v35 = vpop.f32.mrf.mxu1 }
 0x21f   :  { %v1828_v36 = vadd.f32 %v1505_v35, %v1396_v34 }
 0x220   :  { %v188_v37 = vpop.f32.mrf.mxu1 }
 0x221   :  { %v1830_v38 = vadd.f32 %v1396_v34, %v188_v37  ;;  %214 = vrot.lane.b32.xlu0 %v1828_v36, %s1757_s0 }
 0x223   :  { %212 = vrot.lane.b32.xlu1 %v1830_v38, %s1757_s0  ;;  %1510 = vmatprep.mubr.msk.f32.mxu1 %vm216_vm1, %v1830_v38 }
 0x225   :  { %414 = vrot.lane.b32.xlu0 %v1830_v38, %s1758_s3 }
 0x227   :  { %420 = vrot.lane.b32.xlu1 %v1828_v36, %s1759_s5 }
 0x22b   :  { %418 = vrot.lane.b32.xlu1 %v1830_v38, %s1759_s5 }
 0x22f   :  { %416 = vrot.lane.b32.xlu1 %v1828_v36, %s1758_s3 }
 0x293   :  { %v215_v39 = vpop.permute.xlu0 %214 }
 0x294   :  { %1506 = vmatprep.subr.msk.mxu1 %vm216_vm1, %v215_v39 }
 0x295   :  { %1507 = vmatpush3.xpose.msk.msra.mxu1 %vm216_vm1, %v215_v39  ;;  %v213_v40 = vpop.permute.xlu1 %212 }
 0x296   :  { %1508 = vmatprep.subr.msk.mxu1 %vm216_vm1, %v213_v40 }
 0x297   :  { %v415_v42 = vpop.permute.xlu0 %414 }
 0x299   :  { %1509 = vmatpush3.xpose.msk.msra.mxu1 %vm216_vm1, %v213_v40  ;;  %v421_v41 = vpop.permute.xlu1 %420 }
 0x29a   :  { %1520 = vmatprep.subr.msk.mxu1 %vm216_vm1, %v421_v41 }
 0x29c   :  { %1511 = vmatmul.mubr.msk.f32.vlgmr.msra.gmra.mxu1 %vm216_vm1, %v1828_v36 }
 0x29d   :  { %v419_v43 = vpop.permute.xlu1 %418  ;;  %1521 = vmatpush3.xpose.msk.msra.mxu1 %vm216_vm1, %v421_v41  ;;  %1524 = vmatprep.mubr.msk.f32.mxu1 %vm216_vm1, %v415_v42 }
 0x29e   :  { %1522 = vmatprep.subr.msk.mxu1 %vm216_vm1, %v419_v43 }
 0x2a1   :  { %1523 = vmatpush3.xpose.msk.msra.mxu1 %vm216_vm1, %v419_v43  ;;  %v417_v44 = vpop.permute.xlu1 %416 }
 0x2a4   :  { %1525 = vmatmul.mubr.msk.f32.vlgmr.msra.gmra.mxu1 %vm216_vm1, %v417_v44 }
 0x35c   :  { %v1512_v46 = vpop.f32.mrf.mxu1 }
 0x35d   :  { %v297_v48 = vadd.f32 %v1512_v46, %v1852_v45 }
 0x35e   :  { %v291_v49 = vpop.f32.mrf.mxu1 }
 0x35f   :  { %v292_v50 = vadd.f32 %v291_v49, %v1854_v47  ;;  %v304_v51 = vsel %vm300_vm2, %v297_v48, -inf }
 0x360   :  { %305 = vmax.xlane.f32.xlu1 %v304_v51 }
 0x361   :  { %v301_v52 = vsel %vm300_vm2, %v292_v50, -inf }
 0x362   :  { %302 = vmax.xlane.f32.xlu0 %v301_v52 }
 0x364   :  { %v1526_v53 = vpop.f32.mrf.mxu1 }
 0x365   :  { %v502_v56 = vadd.f32 %v1526_v53, %v1852_v45 }
 0x366   :  { %v496_v54 = vpop.f32.mrf.mxu1 }
 0x367   :  { %v497_v55 = vadd.f32 %v496_v54, %v1854_v47  ;;  %v508_v58 = vsel %vm300_vm2, %v502_v56, -inf }
 0x369   :  { %v505_v57 = vsel %vm300_vm2, %v497_v55, -inf }
 0x36a   :  { %506 = vmax.xlane.f32.xlu0 %v505_v57 }
 0x36e   :  { %509 = vmax.xlane.f32.xlu0 %v508_v58 }
 0x384   :  { %203 = vrot.lane.b32.xlu0 %v1399_v59, %s1760_s8 }
 0x3e9   :  { %v306_v4 = vpop.xlane.xlu1 %305 }
 0x3ea   :  { %v308_v5 = vsub.f32 %v297_v48, %v306_v4 }
 0x3eb   :  { %v303_v60 = vpop.xlane.xlu0 %302 }
 0x3ec   :  { %v311_v6 = vmul.f32 1.442695, %v308_v5  ;;  %v307_v7 = vsub.f32 %v292_v50, %v303_v60 }
 0x3ee   :  { %1626 = vpow2.f32 %v311_v6  ;;  %v309_v8 = vmul.f32 1.442695, %v307_v7 }
 0x3f0   :  { %1628 = vpow2.f32 %v309_v8 }
 0x3f3   :  { %v507_v61 = vpop.xlane.xlu0 %506 }
 0x3f4   :  { %v511_v10 = vsub.f32 %v497_v55, %v507_v61 }
 0x3f6   :  { %v513_v12 = vmul.f32 1.442695, %v511_v10 }
 0x3f7   :  { %v510_v62 = vpop.xlane.xlu0 %509 }
 0x3f8   :  { %v512_v9 = vsub.f32 %v502_v56, %v510_v62 }
 0x3fa   :  { %v515_v11 = vmul.f32 1.442695, %v512_v9 }
 0x3fb   :  { %v204_v63 = vpop.permute.xlu0 %203  ;;  %v1627_v13 = vpop.eup %1626 }
 0x3fc   :  { %v1868_v2 = vmul.f32 %v204_v63, %v1830_v38  ;;  %v1871_v3 = vmul.f32 %v204_v63, %v1828_v36  ;;  %1630 = vpow2.f32 %v515_v11  ;;  %v316_v14 = vsel %vm300_vm2, %v1627_v13, 0.0 }
 0x3fd   :  { %1632 = vpow2.f32 %v513_v12  ;;  %v1629_v15 = vpop.eup %1628 }
 0x3fe   :  { %327 = vrot.lane.b32.xlu1 %v1871_v3, %s1760_s8  ;;  %325 = vrot.lane.b32.xlu0 %v1868_v2, %s1760_s8  ;;  %v313_v16 = vsel %vm300_vm2, %v1629_v15, 0.0 }
 0x402   :  { %631 = vrot.lane.b32.xlu1 %v1828_v36, %s1761_s9  ;;  %529 = vrot.lane.b32.xlu0 %v1871_v3, %s1762_s2 }
 0x406   :  { %527 = vrot.lane.b32.xlu0 %v1868_v2, %s1762_s2 }
 0x409   :  { %v1631_v17 = vpop.eup %1630 }
 0x40a   :  { %629 = vrot.lane.b32.xlu0 %v1830_v38, %s1761_s9  ;;  %v520_v18 = vsel %vm300_vm2, %v1631_v17, 0.0  ;;  %v1633_v19 = vpop.eup %1632 }
 0x40b   :  { %v517_v20 = vsel %vm300_vm2, %v1633_v19, 0.0 }
 0x40e   :  { %627 = vrot.lane.b32.xlu0 %v1828_v36, %s1763_s10 }
 0x426   :  { %317 = vadd.xlane.f32.xlu1 %v316_v14 }
 0x42a   :  { %314 = vadd.xlane.f32.xlu1 %v313_v16 }
 0x42e   :  { %521 = vadd.xlane.f32.xlu1 %v520_v18 }
 0x432   :  { %518 = vadd.xlane.f32.xlu1 %v517_v20 }
 0x443   :  { %625 = vrot.lane.b32.xlu1 %v1830_v38, %s1763_s10 }
 0x470   :  { %v328_v21 = vpop.permute.xlu1 %327  ;;  %v326_v22 = vpop.permute.xlu0 %325 }
 0x471   :  { %1513 = vmatprep.subr.mxu0 %v328_v21 }
 0x472   :  { %1514 = vmatpush3.msra.mxu0 %v328_v21 }
 0x473   :  { %1515 = vmatprep.subr.mxu0 %v326_v22 }
 0x474   :  { %1516 = vmatpush3.msra.mxu0 %v326_v22  ;;  %v530_v23 = vpop.permute.xlu0 %529  ;;  %v632_v24 = vpop.permute.xlu1 %631 }
 0x475   :  { %1527 = vmatprep.subr.mxu0 %v530_v23 }
 0x478   :  { %v528_v33 = vpop.permute.xlu0 %527 }
 0x47c   :  { %v630_v41 = vpop.permute.xlu0 %629 }
 0x480   :  { %v628_v42 = vpop.permute.xlu0 %627 }
 0x4af   :  { %v318_v25 = vpop.xlane.xlu1 %317 }
 0x4b0   :  { %1634 = vrcp.f32 %v318_v25 }
 0x4b3   :  { %v315_v26 = vpop.xlane.xlu1 %314 }
 0x4b4   :  { %1636 = vrcp.f32 %v315_v26 }
 0x4b7   :  { %v522_v27 = vpop.xlane.xlu1 %521 }
 0x4b8   :  { %1638 = vrcp.f32 %v522_v27 }
 0x4bb   :  { %v519_v28 = vpop.xlane.xlu1 %518 }
 0x4bc   :  { %1640 = vrcp.f32 %v519_v28 }
 0x4bd   :  { %v1635_v29 = vpop.eup %1634 }
 0x4be   :  { %v322_v32 = vmul.f32 %v1635_v29, %v1627_v13 }
 0x4bf   :  { %v626_v40 = vpop.permute.xlu1 %625 }
 0x4c1   :  { %v1637_v30 = vpop.eup %1636 }
 0x4c2   :  { %v321_v31 = vmul.f32 %v1637_v30, %v1629_v15 }
 0x4c4   :  { %1517 = vmatprep.mubr.msk.f32.mxu0 %vm300_vm2, %v321_v31 }
 0x4c5   :  { %1518 = vmatmul.mubr.msk.f32.vlgmr.msra.gmra.mxu0 %vm300_vm2, %v322_v32  ;;  %v1639_v34 = vpop.eup %1638 }
 0x4c6   :  { %1528 = vmatpush3.msra.mxu0 %v530_v23  ;;  %v526_v39 = vmul.f32 %v1639_v34, %v1631_v17 }
 0x4c7   :  { %1529 = vmatprep.subr.mxu0 %v528_v33 }
 0x4c8   :  { %1530 = vmatpush3.msra.mxu0 %v528_v33 }
 0x4c9   :  { %v1641_v35 = vpop.eup %1640  ;;  %1534 = vmatprep.subr.msk.mxu0 %vm216_vm1, %v632_v24 }
 0x4ca   :  { %v525_v37 = vmul.f32 %v1641_v35, %v1633_v19 }
 0x4cc   :  { %1531 = vmatprep.mubr.msk.f32.mxu0 %vm300_vm2, %v525_v37 }
 0x4cd   :  { %1532 = vmatmul.mubr.msk.f32.vlgmr.msra.gmra.mxu0 %vm300_vm2, %v526_v39 }
 0x4ce   :  { %1535 = vmatpush3.xpose.msk.msra.mxu0 %vm216_vm1, %v632_v24  ;;  %1538 = vmatprep.mubr.msk.f32.mxu0 %vm216_vm1, %v626_v40 }
 0x4cf   :  { %1536 = vmatprep.subr.msk.mxu0 %vm216_vm1, %v630_v41 }
 0x4d2   :  { %1537 = vmatpush3.xpose.msk.msra.mxu0 %vm216_vm1, %v630_v41 }
 0x4d5   :  { %1539 = vmatmul.mubr.msk.f32.vlgmr.msra.gmra.mxu0 %vm216_vm1, %v628_v42 }
 0x585   :  { %v1519_v43 = vpop.f32.mrf.mxu0 }
 0x586   :  { %413 = vst.msk [vmem:[#allocation2 + $0x8] sm:$0xff] %vm216_vm1, %v1519_v43 }
 0x587   :  { %v403_v44 = vpop.f32.mrf.mxu0 }
 0x588   :  { %412 = vst.msk [vmem:[#allocation2] sm:$0xff] %vm216_vm1, %v403_v44  ;;  %v1051_v44 = vld [vmem:[#allocation8 + $0x30] sm:$0xff] }
 0x58d   :  { %v1897_v46 = vpop.f32.mrf.mxu0 }
 0x58f   :  { %v1899_v48 = vpop.f32.mrf.mxu0 }
 0x595   :  { %v1540_v49 = vpop.f32.mrf.mxu0 }
 0x596   :  { %v713_v50 = vadd.f32 %v1540_v49, %v1852_v45 }
 0x597   :  { %v707_v51 = vpop.f32.mrf.mxu0 }
 0x598   :  { %v708_v52 = vadd.f32 %v707_v51, %v1854_v47  ;;  %v719_v53 = vsel %vm300_vm2, %v713_v50, -inf }
 0x599   :  { %720 = vmax.xlane.f32.xlu0 %v719_v53 }
 0x59a   :  { %v716_v54 = vsel %vm300_vm2, %v708_v52, -inf }
 0x59b   :  { %717 = vmax.xlane.f32.xlu1 %v716_v54 }
 0x5ac   :  { %740 = vrot.lane.b32.xlu1 %v1871_v3, %s1764_s11 }
 0x5b0   :  { %842 = vrot.lane.b32.xlu1 %v1828_v36, %s1765_s12 }
 0x5b4   :  { %840 = vrot.lane.b32.xlu1 %v1830_v38, %s1765_s12 }
 0x5b8   :  { %836 = vrot.lane.b32.xlu1 %v1830_v38, %s1766_s13 }
 0x622   :  { %v721_v55 = vpop.xlane.xlu0 %720 }
 0x623   :  { %v723_v56 = vsub.f32 %v713_v50, %v721_v55  ;;  %v1424_v55 = vld [vmem:[#allocation8 + $0xa6] ss:$0 sm:$0xff] }
 0x624   :  { %v718_v57 = vpop.xlane.xlu1 %717 }
 0x625   :  { %v726_v58 = vmul.f32 1.442695, %v723_v56  ;;  %v722_v59 = vsub.f32 %v708_v52, %v718_v57 }
 0x627   :  { %1642 = vpow2.f32 %v726_v58  ;;  %v724_v60 = vmul.f32 1.442695, %v722_v59 }
 0x628   :  { %v741_v61 = vpop.permute.xlu1 %740 }
 0x629   :  { %1644 = vpow2.f32 %v724_v60  ;;  %1541 = vmatprep.subr.mxu1 %v741_v61 }
 0x62a   :  { %1542 = vmatpush3.msra.mxu1 %v741_v61 }
 0x62c   :  { %v843_v8 = vpop.permute.xlu1 %842 }
 0x630   :  { %v841_v9 = vpop.permute.xlu1 %840 }
 0x634   :  { %v1643_v62 = vpop.eup %1642  ;;  %v837_v14 = vpop.permute.xlu1 %836 }
 0x635   :  { %v731_v63 = vsel %vm300_vm2, %v1643_v62, 0.0 }
 0x636   :  { %v1645_v4 = vpop.eup %1644  ;;  %732 = vadd.xlane.f32.xlu0 %v731_v63 }
 0x637   :  { %v728_v5 = vsel %vm300_vm2, %v1645_v4, 0.0 }
 0x63a   :  { %729 = vadd.xlane.f32.xlu0 %v728_v5 }
 0x650   :  { %738 = vrot.lane.b32.xlu0 %v1868_v2, %s1764_s11 }
 0x654   :  { %838 = vrot.lane.b32.xlu0 %v1828_v36, %s1766_s13 }
 0x6bf   :  { %v733_v38 = vpop.xlane.xlu0 %732 }
 0x6c0   :  { %1646 = vrcp.f32 %v733_v38 }
 0x6c3   :  { %v730_v6 = vpop.xlane.xlu0 %729 }
 0x6c4   :  { %1648 = vrcp.f32 %v730_v6 }
 0x6c7   :  { %v739_v7 = vpop.permute.xlu0 %738 }
 0x6c8   :  { %1543 = vmatprep.subr.mxu1 %v739_v7 }
 0x6c9   :  { %1544 = vmatpush3.msra.mxu1 %v739_v7 }
 0x6ca   :  { %1548 = vmatprep.subr.msk.mxu1 %vm216_vm1, %v843_v8 }
 0x6cb   :  { %v839_v36 = vpop.permute.xlu0 %838 }
 0x6cd   :  { %v1647_v10 = vpop.eup %1646 }
 0x6ce   :  { %v737_v13 = vmul.f32 %v1647_v10, %v1643_v62 }
 0x6d1   :  { %v1649_v11 = vpop.eup %1648 }
 0x6d2   :  { %v736_v12 = vmul.f32 %v1649_v11, %v1645_v4  ;;  %v1181_v11 = vld [vmem:[#allocation8 + $0x58] sm:$0xff] }
 0x6d4   :  { %1545 = vmatprep.mubr.msk.f32.mxu1 %vm300_vm2, %v736_v12  ;;  %v1180_v12 = vld [vmem:[#allocation8 + $0x50] sm:$0xff] }
 0x6d5   :  { %1546 = vmatmul.mubr.msk.f32.vlgmr.msra.gmra.mxu1 %vm300_vm2, %v737_v13  ;;  %v1179_v13 = vld [vmem:[#allocation8 + $0x48] sm:$0xff] }
 0x6d6   :  { %1549 = vmatpush3.xpose.msk.msra.mxu1 %vm216_vm1, %v843_v8  ;;  %1552 = vmatprep.mubr.msk.f32.mxu1 %vm216_vm1, %v837_v14  ;;  %v1178_v14 = vld [vmem:[#allocation8 + $0x40] sm:$0xff] }
 0x6d7   :  { %1550 = vmatprep.subr.msk.mxu1 %vm216_vm1, %v841_v9 }
 0x6da   :  { %1551 = vmatpush3.xpose.msk.msra.mxu1 %vm216_vm1, %v841_v9 }
 0x6db   :  { %1573 = vmatprep.subr.mxu1 %v1181_v11 }
 0x6dd   :  { %1553 = vmatmul.mubr.msk.f32.vlgmr.msra.gmra.mxu1 %vm216_vm1, %v839_v36 }
 0x6de   :  { %1574 = vmatpush3.msra.mxu1 %v1181_v11 }
 0x6df   :  { %1575 = vmatprep.subr.mxu1 %v1180_v12 }
 0x6e0   :  { %1576 = vmatpush3.msra.mxu1 %v1180_v12 }
 0x6e1   :  { %1577 = vmatprep.subr.mxu1 %v1179_v13 }
 0x6e2   :  { %1578 = vmatpush3.msra.mxu1 %v1179_v13 }
 0x6e3   :  { %1579 = vmatprep.subr.mxu1 %v1178_v14 }
 0x6e4   :  { %1580 = vmatpush3.msra.mxu1 %v1178_v14 }
 0x795   :  { %v1547_v15 = vpop.f32.mrf.mxu1 }
 0x797   :  { %v816_v16 = vpop.f32.mrf.mxu1 }
 0x79d   :  { %v1554_v17 = vpop.f32.mrf.mxu1 }
 0x79e   :  { %v924_v18 = vadd.f32 %v1554_v17, %v1852_v45 }
 0x79f   :  { %v918_v19 = vpop.f32.mrf.mxu1 }
 0x7a0   :  { %v919_v20 = vadd.f32 %v918_v19, %v1854_v47  ;;  %v930_v21 = vsel %vm300_vm2, %v924_v18, -inf }
 0x7a1   :  { %931 = vmax.xlane.f32.xlu0 %v930_v21  ;;  %v1427_v21 = vld [vmem:[#allocation8 + $0xa4] ss:$0 sm:$0xff] }
 0x7a2   :  { %v927_v22 = vsel %vm300_vm2, %v919_v20, -inf }
 0x7a3   :  { %928 = vmax.xlane.f32.xlu1 %v927_v22 }
 0x7b4   :  { %951 = vrot.lane.b32.xlu1 %v1871_v3, %s1767_s14 }
 0x7b8   :  { %616 = vrot.lane.b32.xlu1 %v1899_v48, %s1755_s21  ;;  %v1049_v48 = vld [vmem:[#allocation8 + $0x20] sm:$0xff] }
 0x7bc   :  { %618 = vrot.lane.b32.xlu1 %v1897_v46, %s1755_s21  ;;  %v1050_v46 = vld [vmem:[#allocation8 + $0x28] sm:$0xff] }
 0x7c0   :  { %827 = vrot.lane.b32.xlu1 %v816_v16, %s1768_s15 }
 0x82a   :  { %v932_v45 = vpop.xlane.xlu0 %931 }
 0x82b   :  { %v934_v47 = vsub.f32 %v924_v18, %v932_v45  ;;  %v1428_v45 = vld [vmem:[#allocation8 + $0xa5] ss:$0 sm:$0xff] }
 0x82c   :  { %v929_v23 = vpop.xlane.xlu1 %928 }
 0x82d   :  { %v937_v24 = vmul.f32 1.442695, %v934_v47  ;;  %v933_v25 = vsub.f32 %v919_v20, %v929_v23 }
 0x82f   :  { %1650 = vpow2.f32 %v937_v24  ;;  %v935_v26 = vmul.f32 1.442695, %v933_v25 }
 0x830   :  { %v952_v27 = vpop.permute.xlu1 %951 }
 0x831   :  { %1652 = vpow2.f32 %v935_v26  ;;  %1555 = vmatprep.subr.mxu0 %v952_v27 }
 0x832   :  { %1556 = vmatpush3.msra.mxu0 %v952_v27 }
 0x834   :  { %v617_v3 = vpop.permute.xlu1 %616 }
 0x835   :  { %623 = vst.msk [vmem:[#allocation2] sm:$0xff] %vm622_vm3, %v617_v3  ;;  %v1190_v3 = vld [vmem:[#allocation8 + $0x98] sm:$0xff] }
 0x838   :  { %v619_v28 = vpop.permute.xlu1 %618 }
 0x839   :  { %624 = vst.msk [vmem:[#allocation2 + $0x8] sm:$0xff] %vm622_vm3, %v619_v28  ;;  %v1189_v28 = vld [vmem:[#allocation8 + $0x90] sm:$0xff] }
 0x83c   :  { %v1651_v29 = vpop.eup %1650  ;;  %v828_v30 = vpop.permute.xlu1 %827 }
 0x83d   :  { %834 = vst.msk [vmem:[#allocation2] sm:$0xff] %vm833_vm4, %v828_v30  ;;  %v942_v31 = vsel %vm300_vm2, %v1651_v29, 0.0  ;;  %v1187_v30 = vld [vmem:[#allocation8 + $0x80] sm:$0xff] }
 0x83e   :  { %v1653_v32 = vpop.eup %1652  ;;  %943 = vadd.xlane.f32.xlu0 %v942_v31  ;;  %v1186_v31 = vld [vmem:[#allocation8 + $0x78] sm:$0xff] }
 0x83f   :  { %v939_v33 = vsel %vm300_vm2, %v1653_v32, 0.0 }
 0x842   :  { %940 = vadd.xlane.f32.xlu0 %v939_v33  ;;  %v1184_v33 = vld [vmem:[#allocation8 + $0x68] sm:$0xff] }
 0x858   :  { %949 = vrot.lane.b32.xlu0 %v1868_v2, %s1767_s14  ;;  %v1052_v2 = vld [vmem:[#allocation8 + $0x38] sm:$0xff] }
 0x85c   :  { %829 = vrot.lane.b32.xlu0 %v1547_v15, %s1768_s15 }
 0x8c7   :  { %v944_v34 = vpop.xlane.xlu0 %943 }
 0x8c8   :  { %1654 = vrcp.f32 %v944_v34  ;;  %v1183_v34 = vld [vmem:[#allocation8 + $0x60] sm:$0xff] }
 0x8cb   :  { %v941_v35 = vpop.xlane.xlu0 %940 }
 0x8cc   :  { %1656 = vrcp.f32 %v941_v35  ;;  %v1429_v35 = vld [vmem:[#allocation8 + $0xa1] ss:$0 sm:$0xff] }
 0x8cf   :  { %v950_v37 = vpop.permute.xlu0 %949 }
 0x8d0   :  { %1557 = vmatprep.subr.mxu0 %v950_v37 }
 0x8d1   :  { %1558 = vmatpush3.msra.mxu0 %v950_v37 }
 0x8d2   :  { %1562 = vmatprep.subr.mxu0 %v1052_v2 }
 0x8d3   :  { %v830_v39 = vpop.permute.xlu0 %829 }
 0x8d4   :  { %835 = vst.msk [vmem:[#allocation2 + $0x8] sm:$0xff] %vm833_vm4, %v830_v39 }
 0x8d5   :  { %v1655_v40 = vpop.eup %1654 }
 0x8d6   :  { %v948_v43 = vmul.f32 %v1655_v40, %v1651_v29  ;;  %v1188_v29 = vld [vmem:[#allocation8 + $0x88] sm:$0xff] }
 0x8d9   :  { %v1657_v41 = vpop.eup %1656 }
 0x8da   :  { %v947_v42 = vmul.f32 %v1657_v41, %v1653_v32  ;;  %v1185_v32 = vld [vmem:[#allocation8 + $0x70] sm:$0xff] }
 0x8dc   :  { %1559 = vmatprep.mubr.msk.f32.mxu0 %vm300_vm2, %v947_v42 }
 0x8dd   :  { %1560 = vmatmul.mubr.msk.f32.vlgmr.msra.gmra.mxu0 %vm300_vm2, %v948_v43 }
 0x8de   :  { %1563 = vmatpush3.msra.mxu0 %v1052_v2 }
 0x8df   :  { %1564 = vmatprep.subr.mxu0 %v1051_v44 }
 0x8e0   :  { %1565 = vmatpush3.msra.mxu0 %v1051_v44 }
 0x8e1   :  { %1566 = vmatprep.subr.mxu0 %v1050_v46 }
 0x8e2   :  { %1567 = vmatpush3.msra.mxu0 %v1050_v46 }
 0x8e3   :  { %1568 = vmatprep.subr.mxu0 %v1049_v48 }
 0x8e4   :  { %1569 = vmatpush3.msra.mxu0 %v1049_v48 }
 0x8e5   :  { %1584 = vmatprep.subr.mxu0 %v1190_v3 }
 0x99d   :  { %v1561_v49 = vpop.f32.mrf.mxu0 }
 0x99e   :  { %1040 = vrot.lane.b32.xlu0 %v1561_v49, %s1769_s16 }
 0x99f   :  { %v1027_v50 = vpop.f32.mrf.mxu0 }
 0x9a0   :  { %1038 = vrot.lane.b32.xlu1 %v1027_v50, %s1769_s16 }
 0xa10   :  { %v1041_v51 = vpop.permute.xlu0 %1040 }
 0xa11   :  { %1046 = vst.msk [vmem:[#allocation2 + $0x8] sm:$0xff] %vm1044_vm5, %v1041_v51 }
 0xa12   :  { %v1039_v52 = vpop.permute.xlu1 %1038 }
 0xa13   :  { %1045 = vst.msk [vmem:[#allocation2] sm:$0xff] %vm1044_vm5, %v1039_v52 }
 0xa18   :  { %v1048_v54 = vld [vmem:[#allocation2 + $0x8] sm:$0xff] }
 0xa1a   :  { %v1047_v53 = vld [vmem:[#allocation2] sm:$0xff] }
 0xa1b   :  { %1570 = vmatprep.mubr.msk.f32.mxu0 %vm67_vm0, %v1047_v53  ;;  %v1432_v53 = vld [vmem:[#allocation8 + $0xa7] ss:$0 sm:$0xff] }
 0xa1c   :  { %1571 = vmatmul.mubr.msk.f32.vlgmr.msra.gmra.mxu0 %vm67_vm0, %v1048_v54 }
 0xa1d   :  { %1585 = vmatpush3.msra.mxu0 %v1190_v3 }
 0xa1e   :  { %1586 = vmatprep.subr.mxu0 %v1189_v28 }
 0xa1f   :  { %1587 = vmatpush3.msra.mxu0 %v1189_v28 }
 0xa20   :  { %1588 = vmatprep.subr.mxu0 %v1188_v29 }
 0xa21   :  { %1589 = vmatpush3.msra.mxu0 %v1188_v29 }
 0xa22   :  { %1590 = vmatprep.subr.mxu0 %v1187_v30 }
 0xa23   :  { %1591 = vmatpush3.msra.mxu0 %v1187_v30 }
 0xa24   :  { %1592 = vmatprep.subr.mxu0 %v1186_v31 }
 0xa25   :  { %1593 = vmatpush3.msra.mxu0 %v1186_v31 }
 0xa26   :  { %1594 = vmatprep.subr.mxu0 %v1185_v32 }
 0xa27   :  { %1595 = vmatpush3.msra.mxu0 %v1185_v32 }
 0xa28   :  { %1596 = vmatprep.subr.mxu0 %v1184_v33 }
 0xa29   :  { %1597 = vmatpush3.msra.mxu0 %v1184_v33 }
 0xa2a   :  { %1598 = vmatprep.subr.mxu0 %v1183_v34 }
 0xa2b   :  { %1599 = vmatpush3.msra.mxu0 %v1183_v34 }
 0xadc   :  { %v1572_v56 = vpop.f32.mrf.mxu0 }
 0xadd   :  { %v1135_v57 = vadd.f32 %v1572_v56, %v1424_v55 }
 0xade   :  { %v1129_v58 = vpop.f32.mrf.mxu0 }
 0xadf   :  { %v1942_v59 = vadd.f32 %v1135_v57, %v1816_v1  ;;  %v1130_v60 = vadd.f32 %v1424_v55, %v1129_v58 }
 0xae1   :  { %v1945_v61 = vadd.f32 %v1130_v60, %v1814_v0  ;;  %v1143_v62 = vsel %vm67_vm0, %v1942_v59, 0.0 }
 0xae2   :  { %1144 = vadd.xlane.f32.xlu0 %v1143_v62 }
 0xae3   :  { %v1140_v63 = vsel %vm67_vm0, %v1945_v61, 0.0 }
 0xae4   :  { %1141 = vadd.xlane.f32.xlu1 %v1140_v63 }
 0xb6b   :  { %v1145_v4 = vpop.xlane.xlu0 %1144 }
 0xb6c   :  { %v1147_v5 = vmul.f32 0.03125, %v1145_v4 }
 0xb6d   :  { %v1142_v38 = vpop.xlane.xlu1 %1141 }
 0xb6e   :  { %v1146_v6 = vmul.f32 0.03125, %v1142_v38  ;;  %v1149_v7 = vsub.f32 %v1942_v59, %v1147_v5 }
 0xb70   :  { %v1148_v1 = vsub.f32 %v1945_v61, %v1146_v6  ;;  %v1151_v9 = vmul.f32 %v1149_v7, %v1149_v7 }
 0xb72   :  { %v1150_v8 = vmul.f32 %v1148_v1, %v1148_v1  ;;  %v1155_v10 = vsel %vm67_vm0, %v1151_v9, 0.0 }
 0xb74   :  { %v1152_v0 = vsel %vm67_vm0, %v1150_v8, 0.0 }
 0xb75   :  { %1153 = vadd.xlane.f32.xlu0 %v1152_v0 }
 0xb79   :  { %1156 = vadd.xlane.f32.xlu0 %v1155_v10 }
 0xbfe   :  { %v1154_v36 = vpop.xlane.xlu0 %1153 }
 0xbff   :  { %v1158_v15 = vmul.f32 0.03125, %v1154_v36 }
 0xc01   :  { %v1160_v16 = vadd.f32 1e-05, %v1158_v15 }
 0xc02   :  { %v1157_v17 = vpop.xlane.xlu0 %1156 }
 0xc03   :  { %1658 = vrsqrt.f32 %v1160_v16  ;;  %v1159_v18 = vmul.f32 0.03125, %v1157_v17 }
 0xc05   :  { %v1161_v19 = vadd.f32 1e-05, %v1159_v18 }
 0xc07   :  { %1660 = vrsqrt.f32 %v1161_v19 }
 0xc10   :  { %v1659_v20 = vpop.eup %1658 }
 0xc11   :  { %v1164_v22 = vmul.f32 %v1659_v20, %v1148_v1 }
 0xc13   :  { %v1170_v47 = vmul.f32 %v1427_v21, %v1164_v22 }
 0xc14   :  { %v1661_v23 = vpop.eup %1660 }
 0xc15   :  { %v1165_v24 = vmul.f32 %v1661_v23, %v1149_v7  ;;  %v1176_v25 = vadd.f32 %v1428_v45, %v1170_v47 }
 0xc17   :  { %v1171_v26 = vmul.f32 %v1427_v21, %v1165_v24  ;;  %1581 = vmatprep.mubr.msk.f32.mxu1 %vm67_vm0, %v1176_v25 }
 0xc19   :  { %v1177_v27 = vadd.f32 %v1428_v45, %v1171_v26 }
 0xc1b   :  { %1582 = vmatmul.mubr.msk.f32.vlgmr.msra.gmra.mxu1 %vm67_vm0, %v1177_v27 }
 0xcdb   :  { %v1583_v37 = vpop.f32.mrf.mxu1 }
 0xcdc   :  { %v1273_v39 = vadd.f32 %v1583_v37, %v1429_v35 }
 0xcdd   :  { %v1267_v40 = vpop.f32.mrf.mxu1 }
 0xcde   :  { %v1279_v41 = vmul.f32 0.70710677, %v1273_v39  ;;  %v1268_v42 = vadd.f32 %v1429_v35, %v1267_v40  ;;  %v1277_v50 = vmul.f32 0.5, %v1273_v39 }
 0xce0   :  { %1662 = verf.f32 %v1279_v41  ;;  %v1278_v43 = vmul.f32 0.70710677, %v1268_v42  ;;  %v1276_v48 = vmul.f32 0.5, %v1268_v42 }
 0xce2   :  { %1664 = verf.f32 %v1278_v43 }
 0xced   :  { %v1663_v2 = vpop.eup %1662 }
 0xcee   :  { %v1283_v46 = vadd.f32 1.0, %v1663_v2 }
 0xcef   :  { %v1665_v44 = vpop.eup %1664 }
 0xcf0   :  { %v1282_v49 = vadd.f32 1.0, %v1665_v44  ;;  %v1285_v52 = vmul.f32 %v1283_v46, %v1277_v50 }
 0xcf2   :  { %v1284_v51 = vmul.f32 %v1282_v49, %v1276_v48 }
 0xcf4   :  { %1600 = vmatprep.mubr.msk.f32.mxu0 %vm1290_vm6, %v1284_v51 }
 0xcf5   :  { %1601 = vmatmul.mubr.msk.f32.vlgmr.msra.gmra.mxu0 %vm1290_vm6, %v1285_v52 }
 0xdb5   :  { %v1602_v54 = vpop.f32.mrf.mxu0 }
 0xdb6   :  { %v1369_v55 = vadd.f32 %v1602_v54, %v1432_v53 }
 0xdb7   :  { %v1363_v56 = vpop.f32.mrf.mxu0 }
 0xdb8   :  { %v1373_v57 = vadd.f32 %v1369_v55, %v1942_v59  ;;  %v1364_v58 = vadd.f32 %v1432_v53, %v1363_v56 }
 0xdba   :  { %1375 = vst.msk [vmem:[#allocation9 + $0x8] sm:$0xff] %vm67_vm0, %v1373_v57  ;;  %v1372_v60 = vadd.f32 %v1364_v58, %v1945_v61 }
 0xdbc   :  { %1374 = vst.msk [vmem:[#allocation9] sm:$0xff] %vm67_vm0, %v1372_v60 }
 0xdbd   :  { %1737 = shalt.err (!%p1734_p5)
}
 0xdbe   :  { %1387 = dma.vmem_to_hbm [thread:$0]  %s1382_s18, 256, %s1971_s4, [#allocation5], %s1754_s20, %s1754_s20, %s1755_s21  }
 0xdbf   :  { %1750 = dma.done.wait [#allocation5], 256  }
 0xdc0   :  { %1751 = vsyncadd [#allocation5], 4294967040 }
 0xdc1   :  { %1391 = vsyncpa [#allocation4], 1 }
 0xdc2   :  { %1392 = vsyncpa [#allocation7], 1 }
 0xdc3   :  { %1393 = vsyncpa [#allocation5], 1 }

</bundles_post_ra>
